<compile_context>
chip_gen: v6e
topology: v6e:2x2x1
jax: 0.10.0
libtpu: 0.0.40
codegen_flags: <defaults>
</compile_context>

<pallas_src>
import functools

import jax
import jax.numpy as jnp
from jax.experimental import pallas as pl
from jax.experimental.pallas import tpu as pltpu

NUM_EMBEDDINGS = 20          # Embedding(20, hidden_dim) in the PyTorch module
LANE = 128
TARGET_OUT_TILE_BYTES = 4 * 1024 * 1024
MAX_TILE_F = 8192
VMEM_LIMIT_BYTES = 32 * 1024 * 1024


def _round_up(x, m):
    return (x + m - 1) // m * m


def _mxu_lane_target():
    """Lanes per folded output row: 256 on v6e/v7x (256x256 MXU), else 128."""
    try:
        kind = jax.devices()[0].device_kind.lower()
    except Exception:
        return LANE
    if ("v6" in kind) or ("v7" in kind) or ("7x" in kind):
        return 2 * LANE
    return LANE


def _choose_fold(hidden, lane_target):
    """Return (k nodes folded per output row, padded hidden width)."""
    if lane_target % hidden == 0:
        return lane_target // hidden, hidden       # e.g. H=32 -> k=8 (v6e/v7x) / k=4 (v5e)
    if hidden % LANE == 0:
        return 1, hidden                           # already lane-dense
    h_pad = _round_up(hidden, LANE)                # e.g. H=100 -> 128 (28% col padding)
    if lane_target % h_pad == 0 and lane_target > h_pad:
        return lane_target // h_pad, h_pad
    return 1, h_pad


def _split_bf16x3(x_f32):
    """Split f32 into 3 bf16 components with c0+c1+c2 ~= x (rel err ~2^-27)."""
    c0 = x_f32.astype(jnp.bfloat16)
    r1 = x_f32 - c0.astype(jnp.float32)
    c1 = r1.astype(jnp.bfloat16)
    r2 = r1 - c1.astype(jnp.float32)
    c2 = r2.astype(jnp.bfloat16)
    return c0, c1, c2


def _degree_embed_kernel(idx_ref, rhs_ref, out_ref, *, k, num_pad):
    # idx_ref: (TILE_F, k)               int8  -- k node degrees per output row
    # rhs_ref: (3, k*num_pad, k*h_pad)   bf16  -- block-diag table, bf16x3 split
    # out_ref: (TILE_F, k*h_pad)         emb dtype
    idx = idx_ref[...].astype(jnp.int32)
    tile_f = idx.shape[0]

    # One-hot via a single compare per fold slot: (iota == degree), lane-concat.
    iota = jax.lax.broadcasted_iota(jnp.int32, (tile_f, num_pad), 1)
    cols = [(iota == idx[:, j:j + 1]).astype(jnp.bfloat16) for j in range(k)]
    onehot = jnp.concatenate(cols, axis=1) if k > 1 else cols[0]

    # gather == one-hot @ block-diagonal table on the MXU.  Three single-pass
    # bf16 matmuls (the 0/1 LHS is exact in bf16) summed in f32 reproduce the
    # f32 table rows to ~1 ulp without 6-pass HIGHEST-precision f32 matmuls.
    acc = jnp.dot(onehot, rhs_ref[0], preferred_element_type=jnp.float32)
    acc = acc + jnp.dot(onehot, rhs_ref[1], preferred_element_type=jnp.float32)
    acc = acc + jnp.dot(onehot, rhs_ref[2], preferred_element_type=jnp.float32)
    out_ref[...] = acc.astype(out_ref.dtype)


@jax.jit
def mlp_degree_encoder(node_degree, emb_table):
    """Equivalent of MLPDegreeEncoder.forward: emb_table[node_degree]."""
    orig_shape = node_degree.shape
    num_emb, hidden = emb_table.shape
    num_pad = max(16, _round_up(num_emb, 16))      # 20 rows -> 32 (sublane-friendly)

    lane_target = _mxu_lane_target()
    k, h_pad = _choose_fold(hidden, lane_target)
    row_width = k * h_pad                          # multiple of 128 -> unmasked stores
    out_dtype = emb_table.dtype
    row_bytes = row_width * jnp.dtype(out_dtype).itemsize

    flat = node_degree.reshape(-1)
    n = flat.shape[0]
    n_fold = pl.cdiv(n, k)

    # ~4 MiB output tiles (multiple of 32 rows), clamped so the grid keeps
    # >= ~4 steps when the input is big enough (pipelining + v7x 2-TC sharding).
    tile_f = TARGET_OUT_TILE_BYTES // max(row_bytes, 1)
    tile_f = min(tile_f, MAX_TILE_F)
    tile_f = min(tile_f, _round_up(pl.cdiv(n_fold, 4), 32))
    tile_f = max(32, tile_f // 32 * 32)

    grid_steps = pl.cdiv(n_fold, tile_f)
    n_fold_pad = grid_steps * tile_f
    n_pad = n_fold_pad * k

    # Pad with degree 0 (gathers row 0; sliced away below) and DMA as int8 so
    # the (tile_f, k) index block lane-pads to 1/4 the VMEM of int32.
    flat = jnp.pad(flat, (0, n_pad - n))
    idx_folded = flat.reshape(n_fold_pad, k).astype(jnp.int8)

    # Resident RHS: 20-row table zero-padded to (num_pad, h_pad), split into
    # 3 bf16 components, replicated block-diagonally so one matmul emits the
    # k gathered embeddings of a folded row contiguously (lane-dense store).
    table_pad = (
        jnp.zeros((num_pad, h_pad), jnp.float32)
        .at[:num_emb, :hidden].set(emb_table.astype(jnp.float32))
    )
    comps = _split_bf16x3(table_pad)
    if k > 1:
        eye_k = jnp.eye(k, dtype=jnp.bfloat16)
        comps = [jnp.kron(eye_k, c) for c in comps]
    rhs = jnp.stack(comps, axis=0)                 # (3, k*num_pad, k*h_pad) bf16

    kernel = functools.partial(_degree_embed_kernel, k=k, num_pad=num_pad)

    out = pl.pallas_call(
        kernel,
        out_shape=jax.ShapeDtypeStruct((n_fold_pad, row_width), out_dtype),
        grid=(grid_steps,),
        in_specs=[
            # node degrees: tiled along the grid, auto double-buffered.
            pl.BlockSpec((tile_f, k), lambda i: (i, 0)),
            # block-diagonal table: constant index_map -> fetched once, kept
            # resident (Pallas skips re-DMA when the block index repeats).
            pl.BlockSpec(rhs.shape, lambda i: (0, 0, 0)),
        ],
        out_specs=pl.BlockSpec((tile_f, row_width), lambda i: (i, 0)),
        compiler_params=pltpu.CompilerParams(
            dimension_semantics=("parallel",),
            vmem_limit_bytes=VMEM_LIMIT_BYTES,
        ),
    )(idx_folded, rhs)

    # Folded rows hold k consecutive (possibly column-padded) embeddings; a
    # row-major reshape + slice recovers the per-node layout (pure layout).
    out = out.reshape(n_pad, h_pad)[:n, :hidden]
    return out.reshape(*orig_shape, hidden)


if __name__ == "__main__":
    key = jax.random.PRNGKey(0)
    k_idx, k_emb, k_idx2, k_emb2 = jax.random.split(key, 4)

    # Small shapes consistent with the module.
    batch, num_nodes, hidden_dim = 2, 8, 32

    # Deterministic "parameters": Embedding(20, hidden_dim), N(0, 1) init.
    emb_table = jax.random.normal(k_emb, (NUM_EMBEDDINGS, hidden_dim), jnp.float32)

    # Deterministic example input: node degrees in [0, 20).
    node_degree = jax.random.randint(
        k_idx, (batch, num_nodes), minval=0, maxval=NUM_EMBEDDINGS, dtype=jnp.int32
    )

    out = jax.block_until_ready(mlp_degree_encoder(node_degree, emb_table))
    ref = jnp.take(emb_table, node_degree, axis=0)
    assert out.shape == (batch, num_nodes, hidden_dim), out.shape
    assert jnp.allclose(out, ref, atol=1e-5, rtol=1e-5), "mismatch vs reference (small)"

    # Larger shape: multi-step grid, node padding, lane-dense folded path.
    node_degree2 = jax.random.randint(
        k_idx2, (4, 3000), minval=0, maxval=NUM_EMBEDDINGS, dtype=jnp.int32
    )
    out2 = jax.block_until_ready(mlp_degree_encoder(node_degree2, emb_table))
    ref2 = jnp.take(emb_table, node_degree2, axis=0)
    assert out2.shape == (4, 3000, hidden_dim), out2.shape
    assert jnp.allclose(out2, ref2, atol=1e-5, rtol=1e-5), "mismatch vs reference (large)"

    # Module-default hidden_dim=100: exercises the column-padded lane-dense path.
    emb_table100 = jax.random.normal(k_emb2, (NUM_EMBEDDINGS, 100), jnp.float32)
    out3 = jax.block_until_ready(mlp_degree_encoder(node_degree, emb_table100))
    ref3 = jnp.take(emb_table100, node_degree, axis=0)
    assert out3.shape == (batch, num_nodes, 100), out3.shape
    assert jnp.allclose(out3, ref3, atol=1e-5, rtol=1e-5), "mismatch vs reference (H=100)"

    # TODO(synk): out-of-range / negative degrees return a zero row instead of
    # raising like torch.nn.Embedding (no clean in-kernel error path).
    print("KERNEL_OK")
</pallas_src>

<mosaic_0001>
module attributes {stable_mosaic.version = 11 : i64} {
  func.func @_degree_embed_kernel(%arg0: i32, %arg1: memref<32x4xi8, #tpu.memory_space<vmem>>, %arg2: memref<3x128x128xbf16, #tpu.memory_space<vmem>>, %arg3: memref<32x128xf32, #tpu.memory_space<vmem>>) attributes {dimension_semantics = [#tpu.dimension_semantics<parallel>], iteration_bounds = array<i64: 1>, scalar_prefetch = 0 : i64, scratch_operands = 0 : i64, tpu.core_type = #tpu.core_type<tc>, window_params = [{transform_indices = @transform_0, window_bounds = array<i64: 32, 4>}, {pipeline_mode = #tpu.pipeline_mode<synchronous>, transform_indices = @transform_1, window_bounds = array<i64: 3, 128, 128>}, {transform_indices = @transform_2, window_bounds = array<i64: 32, 128>}]} {
    %c0 = arith.constant 0 : index
    %c0_0 = arith.constant 0 : index
    %0 = vector.load %arg1[%c0, %c0_0] : memref<32x4xi8, #tpu.memory_space<vmem>>, vector<32x4xi8>
    %1 = arith.extsi %0 : vector<32x4xi8> to vector<32x4xi32>
    %2 = tpu.iota {dimensions = array<i32: 1>} : vector<32x32xi32>
    %3 = vector.extract_strided_slice %1 {offsets = [0, 0], sizes = [32, 1], strides = [1, 1]} : vector<32x4xi32> to vector<32x1xi32>
    %4 = vector.broadcast %3 : vector<32x1xi32> to vector<32x32xi32>
    %5 = arith.cmpi eq, %2, %4 : vector<32x32xi32>
    %6 = arith.extui %5 : vector<32x32xi1> to vector<32x32xi32>
    %7 = arith.sitofp %6 : vector<32x32xi32> to vector<32x32xf32>
    %8 = arith.truncf %7 : vector<32x32xf32> to vector<32x32xbf16>
    %9 = vector.extract_strided_slice %1 {offsets = [0, 1], sizes = [32, 1], strides = [1, 1]} : vector<32x4xi32> to vector<32x1xi32>
    %10 = vector.broadcast %9 : vector<32x1xi32> to vector<32x32xi32>
    %11 = arith.cmpi eq, %2, %10 : vector<32x32xi32>
    %12 = arith.extui %11 : vector<32x32xi1> to vector<32x32xi32>
    %13 = arith.sitofp %12 : vector<32x32xi32> to vector<32x32xf32>
    %14 = arith.truncf %13 : vector<32x32xf32> to vector<32x32xbf16>
    %15 = vector.extract_strided_slice %1 {offsets = [0, 2], sizes = [32, 1], strides = [1, 1]} : vector<32x4xi32> to vector<32x1xi32>
    %16 = vector.broadcast %15 : vector<32x1xi32> to vector<32x32xi32>
    %17 = arith.cmpi eq, %2, %16 : vector<32x32xi32>
    %18 = arith.extui %17 : vector<32x32xi1> to vector<32x32xi32>
    %19 = arith.sitofp %18 : vector<32x32xi32> to vector<32x32xf32>
    %20 = arith.truncf %19 : vector<32x32xf32> to vector<32x32xbf16>
    %21 = vector.extract_strided_slice %1 {offsets = [0, 3], sizes = [32, 1], strides = [1, 1]} : vector<32x4xi32> to vector<32x1xi32>
    %22 = vector.broadcast %21 : vector<32x1xi32> to vector<32x32xi32>
    %23 = arith.cmpi eq, %2, %22 : vector<32x32xi32>
    %24 = arith.extui %23 : vector<32x32xi1> to vector<32x32xi32>
    %25 = arith.sitofp %24 : vector<32x32xi32> to vector<32x32xf32>
    %26 = arith.truncf %25 : vector<32x32xf32> to vector<32x32xbf16>
    %27 = tpu.concatenate %8, %14, %20, %26 in 1 : vector<32x32xbf16>, vector<32x32xbf16>, vector<32x32xbf16>, vector<32x32xbf16> -> vector<32x128xbf16>
    %c0_1 = arith.constant 0 : index
    %c0_2 = arith.constant 0 : index
    %c0_3 = arith.constant 0 : index
    %28 = vector.load %arg2[%c0_1, %c0_2, %c0_3] : memref<3x128x128xbf16, #tpu.memory_space<vmem>>, vector<1x128x128xbf16>
    %29 = vector.shape_cast %28 : vector<1x128x128xbf16> to vector<128x128xbf16>
    %cst = arith.constant dense<0.000000e+00> : vector<32x128xf32>
    %30 = tpu.matmul %27, %29, %cst {dimension_numbers = #tpu.dot_dimension_numbers<[1], [0], [0], [1], [0, 0, 1, 1], [], []>} : vector<32x128xbf16>, vector<128x128xbf16>, vector<32x128xf32> -> vector<32x128xf32>
    %c1 = arith.constant 1 : index
    %c0_4 = arith.constant 0 : index
    %c0_5 = arith.constant 0 : index
    %31 = vector.load %arg2[%c1, %c0_4, %c0_5] : memref<3x128x128xbf16, #tpu.memory_space<vmem>>, vector<1x128x128xbf16>
    %32 = vector.shape_cast %31 : vector<1x128x128xbf16> to vector<128x128xbf16>
    %cst_6 = arith.constant dense<0.000000e+00> : vector<32x128xf32>
    %33 = tpu.matmul %27, %32, %cst_6 {dimension_numbers = #tpu.dot_dimension_numbers<[1], [0], [0], [1], [0, 0, 1, 1], [], []>} : vector<32x128xbf16>, vector<128x128xbf16>, vector<32x128xf32> -> vector<32x128xf32>
    %34 = arith.addf %30, %33 : vector<32x128xf32>
    %c2 = arith.constant 2 : index
    %c0_7 = arith.constant 0 : index
    %c0_8 = arith.constant 0 : index
    %35 = vector.load %arg2[%c2, %c0_7, %c0_8] : memref<3x128x128xbf16, #tpu.memory_space<vmem>>, vector<1x128x128xbf16>
    %36 = vector.shape_cast %35 : vector<1x128x128xbf16> to vector<128x128xbf16>
    %cst_9 = arith.constant dense<0.000000e+00> : vector<32x128xf32>
    %37 = tpu.matmul %27, %36, %cst_9 {dimension_numbers = #tpu.dot_dimension_numbers<[1], [0], [0], [1], [0, 0, 1, 1], [], []>} : vector<32x128xbf16>, vector<128x128xbf16>, vector<32x128xf32> -> vector<32x128xf32>
    %38 = arith.addf %34, %37 : vector<32x128xf32>
    %c0_10 = arith.constant 0 : index
    %c0_11 = arith.constant 0 : index
    %39 = vector.load %arg3[%c0_10, %c0_11] : memref<32x128xf32, #tpu.memory_space<vmem>>, vector<32x128xf32>
    tpu.vector_store %arg3[%c0_10, %c0_11], %38 {strides = array<i32>} : memref<32x128xf32, #tpu.memory_space<vmem>>, vector<32x128xf32>,
    return
  }
  func.func @transform_0(%arg0: i32) -> (i32, i32) {
    %c0_i32 = arith.constant 0 : i32
    %c0_i32_0 = arith.constant 0 : i32
    return %arg0, %c0_i32 : i32, i32
  }
  func.func @transform_1(%arg0: i32) -> (i32, i32, i32) {
    %c0_i32 = arith.constant 0 : i32
    %c0_i32_0 = arith.constant 0 : i32
    %c0_i32_1 = arith.constant 0 : i32
    %c0_i32_2 = arith.constant 0 : i32
    return %c0_i32, %c0_i32_0, %c0_i32_1 : i32, i32, i32
  }
  func.func @transform_2(%arg0: i32) -> (i32, i32) {
    %c0_i32 = arith.constant 0 : i32
    %c0_i32_0 = arith.constant 0 : i32
    return %arg0, %c0_i32 : i32, i32
  }
}

</mosaic_0001>

<bundles_post_ra>
// kernel: mlp_degree_encoder.1
= control target key start
LH: loop header
LB: loop body
LE: loop exit
PB: predicated region body
PF: predicated region fallthrough
CT: control target
= control target key end

     0   :  { %v716_v0 = vmov 1   ;;  %v717_v6 = vmov 2   ;;  %v718_v7 = vmov 3   ;;  %v719_v8 = vmov 0   ;;  %s721_s8 = smov 32   ;;  %s722_s14 = smov 64   ;;  %s860_s0 = inlined_call_operand.vmem [shape: s8[32,4], index: 0, kind: input, shape index: {}]   ;;  %s861_s1 = inlined_call_operand.vmem [shape: bf16[3,128,128], index: 1, kind: input, shape index: {}]   ;;  %s862_s2 = inlined_call_operand.vmem [shape: f32[32,128], index: 2, kind: output, shape index: {}]  }
   0x1   :  { %684 = vset.pattern.permute.xlu1 %v716_v0  ;;  %683 = vset.pattern.permute.xlu0 %v716_v0  ;;  %v12_v1 = vld [vmem:[%s860_s0] sm:$0xff]  ;;  %v692_v9 = vld [vmem:[%s861_s1 + $0x78] sm:$0xff]   ;;  %v694_v11 = vld [vmem:[%s861_s1 + $0x70] sm:$0xff]   ;;  %v17_v15 = vlaneseq  ;;  %v720_v23 = vmov 0.0   ;;  %s723_s17 = smov 96  }
   0x2   :  { %v15_v2 = vunpack.c.2.s8 %v12_v1  ;;  %v13_v3 = vunpack.c.0.s8 %v12_v1  ;;  %v16_v4 = vunpack.c.3.s8 %v12_v1  ;;  %v14_v5 = vunpack.c.1.s8 %v12_v1  ;;  %v693_v10 = vld [vmem:[%s861_s1 + $0x38] sm:$0xff]   ;;  %615 = vmatprep.subr.bf16.mxu0 %v692_v9  ;;  %v695_v12 = vld [vmem:[%s861_s1 + $0x30] sm:$0xff]   ;;  %v696_v13 = vld [vmem:[%s861_s1 + $0x68] sm:$0xff]  }
   0x3   :  { %616 = vmatpush3.bf16.msra.mxu0 %v692_v9  ;;  %635 = vmatprep.subr.bf16.mxu1 %v693_v10  ;;  %v697_v14 = vld [vmem:[%s861_s1 + $0x28] sm:$0xff]   ;;  %v698_v16 = vld [vmem:[%s861_s1 + $0x60] sm:$0xff]   ;;  %v766_v18 = vand.u32 127, %v17_v15  ;;  %v700_v21 = vld [vmem:[%s861_s1 + $0x58] sm:$0xff]  }
   0x4   :  { %52 = vperm.xlu1 %684, %v15_v2   ;;  %46 = vperm.xlu0 %683, %v13_v3   ;;  %v699_v17 = vld [vmem:[%s861_s1 + $0x20] sm:$0xff]   ;;  %v701_v22 = vld [vmem:[%s861_s1 + $0x18] sm:$0xff]   ;;  %v702_v27 = vld [vmem:[%s861_s1 + $0x50] sm:$0xff]  }
   0x5   :  { %636 = vmatpush3.bf16.msra.mxu1 %v693_v10  ;;  %617 = vmatprep.subr.bf16.mxu0 %v694_v11  ;;  %v703_v28 = vld [vmem:[%s861_s1 + $0x10] sm:$0xff]   ;;  %v704_v34 = vld [vmem:[%s861_s1 + $0x48] sm:$0xff]   ;;  %v706_v40 = vld [vmem:[%s861_s1 + $0x40] sm:$0xff]  }
   0x6   :  { %637 = vmatprep.subr.bf16.mxu1 %v695_v12  ;;  %v705_v37 = vld [vmem:[%s861_s1 + $0x8] sm:$0xff]   ;;  %v707_v41 = vld [vmem:[%s861_s1] sm:$0xff]   ;;  %v708_v48 = vld [vmem:[%s861_s1 + $0xb8] sm:$0xff]  }
   0x7   :  { %618 = vmatpush3.bf16.msra.mxu0 %v694_v11 }
   0x8   :  { %55 = vperm.xlu1 %684, %v16_v4   ;;  %49 = vperm.xlu0 %683, %v14_v5  }
   0x9   :  { %619 = vmatprep.subr.bf16.mxu0 %v696_v13  ;;  %638 = vmatpush3.bf16.msra.mxu1 %v695_v12 }
   0xa   :  { %639 = vmatprep.subr.bf16.mxu1 %v697_v14 }
   0xb   :  { %620 = vmatpush3.bf16.msra.mxu0 %v696_v13 }
   0xc   :  { %686 = vset.pattern.permute.xlu1 %v717_v6  ;;  %685 = vset.pattern.permute.xlu0 %v717_v6 }
   0xd   :  { %75 = vperm.xlu1 %686, %v14_v5   ;;  %72 = vperm.xlu0 %685, %v13_v3  }
   0xe   :  { %640 = vmatpush3.bf16.msra.mxu1 %v697_v14  ;;  %621 = vmatprep.subr.bf16.mxu0 %v698_v16 }
   0xf   :  { %641 = vmatprep.subr.bf16.mxu1 %v699_v17  ;;  %622 = vmatpush3.bf16.msra.mxu0 %v698_v16  ;;  %v709_v16 = vld [vmem:[%s861_s1 + $0xb0] sm:$0xff]  }
  0x10   :  { %623 = vmatprep.subr.bf16.mxu0 %v700_v21 }
  0x11   :  { %78 = vperm.xlu1 %686, %v15_v2   ;;  %81 = vperm.xlu0 %685, %v16_v4  }
  0x12   :  { %642 = vmatpush3.bf16.msra.mxu1 %v699_v17 }
  0x13   :  { %624 = vmatpush3.bf16.msra.mxu0 %v700_v21  ;;  %643 = vmatprep.subr.bf16.mxu1 %v701_v22  ;;  %v713_v21 = vld [vmem:[%s861_s1 + $0x90] sm:$0xff]  }
  0x14   :  { %625 = vmatprep.subr.bf16.mxu0 %v702_v27 }
  0x15   :  { %687 = vset.pattern.permute.xlu1 %v718_v7  ;;  %688 = vset.pattern.permute.xlu0 %v718_v7 }
  0x16   :  { %98 = vperm.xlu1 %687, %v13_v3   ;;  %101 = vperm.xlu0 %688, %v14_v5  }
  0x17   :  { %644 = vmatpush3.bf16.msra.mxu1 %v701_v22  ;;  %626 = vmatpush3.bf16.msra.mxu0 %v702_v27  ;;  %v714_v22 = vld [vmem:[%s861_s1 + $0x88] sm:$0xff]  }
  0x18   :  { %645 = vmatprep.subr.bf16.mxu1 %v703_v28  ;;  %627 = vmatprep.subr.bf16.mxu0 %v704_v34 }
  0x1a   :  { %104 = vperm.xlu1 %687, %v15_v2   ;;  %689 = vset.pattern.permute.xlu0 %v719_v8 }
  0x1b   :  { %20 = vperm.xlu0 %689, %v13_v3   ;;  %646 = vmatpush3.bf16.msra.mxu1 %v703_v28 }
  0x1c   :  { %628 = vmatpush3.bf16.msra.mxu0 %v704_v34  ;;  %647 = vmatprep.subr.bf16.mxu1 %v705_v37 }
  0x1d   :  { %629 = vmatprep.subr.bf16.mxu0 %v706_v40 }
  0x1e   :  { %107 = vperm.xlu1 %687, %v16_v4  }
  0x1f   :  { %29 = vperm.xlu0 %689, %v16_v4   ;;  %648 = vmatpush3.bf16.msra.mxu1 %v705_v37 }
  0x20   :  { %649 = vmatprep.subr.bf16.mxu1 %v707_v41  ;;  %630 = vmatpush3.bf16.msra.mxu0 %v706_v40 }
  0x21   :  { %655 = vmatprep.subr.bf16.mxu0 %v708_v48 }
  0x22   :  { %690 = vset.pattern.permute.xlu1 %v719_v8 }
  0x23   :  { %23 = vperm.xlu1 %690, %v14_v5   ;;  %691 = vset.pattern.permute.xlu0 %v718_v7 }
  0x24   :  { %650 = vmatpush3.bf16.msra.mxu1 %v707_v41 }
  0x27   :  { %26 = vperm.xlu1 %690, %v15_v2  }
  0x7f   :  { %v53_v19 = vpop.permute.xlu1 %52  ;;  %v47_v20 = vpop.permute.xlu0 %46 }
  0x80   :  { %vm57_vm0 = vcmp.eq.s32.totalorder %v766_v18, %v47_v20  ;;  %vm59_vm1 = vcmp.eq.s32.totalorder %v766_v18, %v53_v19  ;;  %v711_v19 = vld [vmem:[%s861_s1 + $0xa0] sm:$0xff]   ;;  %v712_v20 = vld [vmem:[%s861_s1 + $0x98] sm:$0xff]  }
  0x81   :  { %v517_v24 = vsel %vm57_vm0, 1.0, %v720_v23  ;;  %v519_v29 = vsel %vm59_vm1, 1.0, %v720_v23  ;;  %vm141_vm0 = vcmask 261120   ;;  %vm148_vm1 = vcmask 523264  }
  0x83   :  { %v56_v25 = vpop.permute.xlu1 %55  ;;  %v50_v26 = vpop.permute.xlu0 %49 }
  0x84   :  { %vm60_vm2 = vcmp.eq.s32.totalorder %v766_v18, %v56_v25  ;;  %vm58_vm3 = vcmp.eq.s32.totalorder %v766_v18, %v50_v26 }
  0x85   :  { %v520_v30 = vsel %vm60_vm2, 1.0, %v720_v23  ;;  %v518_v31 = vsel %vm58_vm3, 1.0, %v720_v23  ;;  %vm153_vm2 = vcmask 785408  }
  0x86   :  { %v70_v32 = vpack.c.bf16 %v520_v30, %v519_v29  ;;  %v69_v33 = vpack.c.bf16 %v518_v31, %v517_v24 }
  0x88   :  { %v76_v35 = vpop.permute.xlu1 %75  ;;  %127 = vrot.lane.b32.xlu0 %v70_v32, %s721_s8  ;;  %v73_v36 = vpop.permute.xlu0 %72  ;;  %125 = vrot.lane.b32.xlu1 %v69_v33, %s721_s8 }
  0x89   :  { %vm84_vm4 = vcmp.eq.s32.totalorder %v766_v18, %v76_v35  ;;  %vm83_vm5 = vcmp.eq.s32.totalorder %v766_v18, %v73_v36 }
  0x8a   :  { %v522_v38 = vsel %vm84_vm4, 1.0, %v720_v23  ;;  %v521_v39 = vsel %vm83_vm5, 1.0, %v720_v23 }
  0x8b   :  { %v95_v42 = vpack.c.bf16 %v522_v38, %v521_v39 }
  0x8c   :  { %v79_v43 = vpop.permute.xlu1 %78  ;;  %v82_v44 = vpop.permute.xlu0 %81 }
  0x8d   :  { %vm85_vm6 = vcmp.eq.s32.totalorder %v766_v18, %v79_v43  ;;  %vm86_vm7 = vcmp.eq.s32.totalorder %v766_v18, %v82_v44  ;;  %131 = vrot.lane.b32.xlu1 %v95_v42, %s722_s14 }
  0x8e   :  { %v523_v45 = vsel %vm85_vm6, 1.0, %v720_v23  ;;  %v524_v46 = vsel %vm86_vm7, 1.0, %v720_v23 }
  0x8f   :  { %v96_v47 = vpack.c.bf16 %v524_v46, %v523_v45 }
  0x91   :  { %v99_v49 = vpop.permute.xlu1 %98  ;;  %133 = vrot.lane.b32.xlu0 %v96_v47, %s722_s14  ;;  %v102_v50 = vpop.permute.xlu0 %101 }
  0x92   :  { %vm109_vm8 = vcmp.eq.s32.totalorder %v766_v18, %v99_v49  ;;  %vm110_vm9 = vcmp.eq.s32.totalorder %v766_v18, %v102_v50 }
  0x93   :  { %v525_v51 = vsel %vm109_vm8, 1.0, %v720_v23  ;;  %v526_v52 = vsel %vm110_vm9, 1.0, %v720_v23 }
  0x94   :  { %v121_v53 = vpack.c.bf16 %v526_v52, %v525_v51 }
  0x95   :  { %v105_v54 = vpop.permute.xlu1 %104 }
  0x96   :  { %137 = vrot.lane.b32.xlu1 %v121_v53, %s723_s17  ;;  %v21_v55 = vpop.permute.xlu0 %20  ;;  %vm111_vm11 = vcmp.eq.s32.totalorder %v766_v18, %v105_v54 }
  0x97   :  { %vm31_vm10 = vcmp.eq.s32.totalorder %v766_v18, %v21_v55  ;;  %v527_v59 = vsel %vm111_vm11, 1.0, %v720_v23 }
  0x98   :  { %v513_v56 = vsel %vm31_vm10, 1.0, %v720_v23 }
  0x99   :  { %v108_v57 = vpop.permute.xlu1 %107 }
  0x9a   :  { %vm112_vm12 = vcmp.eq.s32.totalorder %v766_v18, %v108_v57  ;;  %v30_v58 = vpop.permute.xlu0 %29 }
  0x9b   :  { %v528_v60 = vsel %vm112_vm12, 1.0, %v720_v23  ;;  %vm34_vm13 = vcmp.eq.s32.totalorder %v766_v18, %v30_v58 }
  0x9c   :  { %v122_v61 = vpack.c.bf16 %v528_v60, %v527_v59  ;;  %v516_v62 = vsel %vm34_vm13, 1.0, %v720_v23 }
  0x9e   :  { %139 = vrot.lane.b32.xlu0 %v122_v61, %s723_s17  ;;  %v24_v63 = vpop.permute.xlu1 %23 }
  0x9f   :  { %vm32_vm14 = vcmp.eq.s32.totalorder %v766_v18, %v24_v63 }
  0xa0   :  { %v514_v0 = vsel %vm32_vm14, 1.0, %v720_v23 }
  0xa1   :  { %v43_v1 = vpack.c.bf16 %v514_v0, %v513_v56 }
  0xa2   :  { %v27_v2 = vpop.permute.xlu1 %26 }
  0xa3   :  { %vm33_vm15 = vcmp.eq.s32.totalorder %v766_v18, %v27_v2  ;;  %v710_v18 = vld [vmem:[%s861_s1 + $0xa8] sm:$0xff]  }
  0xa4   :  { %v515_v3 = vsel %vm33_vm15, 1.0, %v720_v23  ;;  %v715_v23 = vld [vmem:[%s861_s1 + $0x80] sm:$0xff]  }
  0xa5   :  { %v44_v4 = vpack.c.bf16 %v516_v62, %v515_v3 }
  0xfa   :  { %v126_v5 = vpop.permute.xlu1 %125  ;;  %v128_v8 = vpop.permute.xlu0 %127 }
  0xfb   :  { %v144_v7 = vsel %vm141_vm0, %v43_v1, %v126_v5  ;;  %v147_v13 = vsel %vm141_vm0, %v44_v4, %v128_v8 }
  0xff   :  { %v132_v6 = vpop.permute.xlu1 %131 }
 0x100   :  { %v150_v9 = vsel %vm148_vm1, %v144_v7, %v132_v6 }
 0x103   :  { %v134_v12 = vpop.permute.xlu0 %133 }
 0x104   :  { %v152_v14 = vsel %vm148_vm1, %v147_v13, %v134_v12 }
 0x108   :  { %v138_v10 = vpop.permute.xlu1 %137 }
 0x109   :  { %v155_v11 = vsel %vm153_vm2, %v150_v9, %v138_v10 }
 0x10a   :  { %631 = vmatprep.mubr.bf16.mxu0 %v155_v11  ;;  %651 = vmatprep.mubr.bf16.mxu1 %v155_v11 }
 0x110   :  { %v140_v15 = vpop.permute.xlu0 %139 }
 0x111   :  { %v158_v17 = vsel %vm153_vm2, %v152_v14, %v140_v15 }
 0x112   :  { %632 = vmatmul.mubr.bf16.vlgmr.msra.gmra.mxu0 %v158_v17  ;;  %652 = vmatmul.mubr.bf16.vlgmr.msra.gmra.mxu1 %v158_v17 }
 0x113   :  { %656 = vmatpush3.bf16.msra.mxu0 %v708_v48  ;;  %671 = vmatprep.mubr.bf16.mxu0 %v155_v11 }
 0x114   :  { %657 = vmatprep.subr.bf16.mxu0 %v709_v16 }
 0x117   :  { %658 = vmatpush3.bf16.msra.mxu0 %v709_v16 }
 0x118   :  { %659 = vmatprep.subr.bf16.mxu0 %v710_v18 }
 0x11b   :  { %660 = vmatpush3.bf16.msra.mxu0 %v710_v18 }
 0x11c   :  { %661 = vmatprep.subr.bf16.mxu0 %v711_v19 }
 0x11f   :  { %662 = vmatpush3.bf16.msra.mxu0 %v711_v19 }
 0x120   :  { %663 = vmatprep.subr.bf16.mxu0 %v712_v20 }
 0x123   :  { %664 = vmatpush3.bf16.msra.mxu0 %v712_v20 }
 0x124   :  { %665 = vmatprep.subr.bf16.mxu0 %v713_v21 }
 0x127   :  { %666 = vmatpush3.bf16.msra.mxu0 %v713_v21 }
 0x128   :  { %667 = vmatprep.subr.bf16.mxu0 %v714_v22 }
 0x12b   :  { %668 = vmatpush3.bf16.msra.mxu0 %v714_v22 }
 0x12c   :  { %669 = vmatprep.subr.bf16.mxu0 %v715_v23 }
 0x12f   :  { %670 = vmatpush3.bf16.msra.mxu0 %v715_v23 }
 0x132   :  { %672 = vmatmul.mubr.bf16.vlgmr.msra.gmra.mxu0 %v158_v17 }
 0x1d2   :  { %v633_v24 = vpop.f32.mrf.mxu0  ;;  %v653_v25 = vpop.f32.mrf.mxu1 }
 0x1d3   :  { %v381_v31 = vadd.f32 %v653_v25, %v633_v24 }
 0x1d4   :  { %v275_v26 = vpop.f32.mrf.mxu0  ;;  %v372_v27 = vpop.f32.mrf.mxu1 }
 0x1d5   :  { %v373_v33 = vadd.f32 %v372_v27, %v275_v26 }
 0x1d6   :  { %v634_v28 = vpop.f32.mrf.mxu0  ;;  %v654_v29 = vpop.f32.mrf.mxu1 }
 0x1d7   :  { %v384_v37 = vadd.f32 %v654_v29, %v634_v28 }
 0x1d8   :  { %v278_v30 = vpop.f32.mrf.mxu0  ;;  %v375_v35 = vpop.f32.mrf.mxu1 }
 0x1d9   :  { %v376_v40 = vadd.f32 %v375_v35, %v278_v30 }
 0x1f2   :  { %v673_v32 = vpop.f32.mrf.mxu0 }
 0x1f3   :  { %v503_v34 = vadd.f32 %v673_v32, %v381_v31 }
 0x1f4   :  { %v486_v36 = vpop.f32.mrf.mxu0 }
 0x1f5   :  { %507 = vst [vmem:[%s862_s2 + $0x10] sm:$0xff] %v503_v34  ;;  %v501_v38 = vadd.f32 %v486_v36, %v373_v33 }
 0x1f6   :  { %v674_v39 = vpop.f32.mrf.mxu0 }
 0x1f7   :  { %505 = vst [vmem:[%s862_s2] sm:$0xff] %v501_v38  ;;  %v504_v41 = vadd.f32 %v674_v39, %v384_v37 }
 0x1f8   :  { %v489_v42 = vpop.f32.mrf.mxu0 }
 0x1f9   :  { %508 = vst [vmem:[%s862_s2 + $0x18] sm:$0xff] %v504_v41  ;;  %v502_v43 = vadd.f32 %v489_v42, %v376_v40 }
 0x1fb   :  { %506 = vst [vmem:[%s862_s2 + $0x8] sm:$0xff] %v502_v43 }

</bundles_post_ra>
